<compile_context>
chip_gen: v5e
topology: v5e:2x2
jax: 0.10.0
libtpu: 0.0.40
codegen_flags: <defaults>
</compile_context>

<pallas_src>
import jax
import jax.numpy as jnp
from jax.experimental import pallas as pl
from jax.experimental.pallas import tpu as pltpu

THRESHOLD = 1.0
LANES = 128      # vreg lane width
SUBLANES = 8     # f32 sublane tiling
_SINGLE_BLOCK_MAX_ROWS = 8   # <= 1024 gates: single block, no grid.
                             # Above: always >= 2 grid steps (v7x 2-TC split).


def _round_up(n, m):
    return ((n + m - 1) // m) * m


# ----------------------------------------------------------------------------
# 1) Exact module semantics: x (2,) -> scalar 1.0 / 0.0.  Scalar (SMEM) path.
#    (Launch-overhead bound by construction; use the batched path for any
#     repeated evaluation.)
# ----------------------------------------------------------------------------
def _or_scalar_kernel(x_ref, w_ref, o_ref):
    # Explicit 2-term weighted sum on the scalar ALU (no vector/XLU work).
    ws = x_ref[0] * w_ref[0] + x_ref[1] * w_ref[1]
    o_ref[0] = jnp.where(ws >= THRESHOLD, jnp.float32(1.0), jnp.float32(0.0))


def mp_neuron_or(x, weights):
    """x: (2,) f32 gate inputs; weights: (2,) f32. Returns scalar f32."""
    out = pl.pallas_call(
        _or_scalar_kernel,
        out_shape=jax.ShapeDtypeStruct((1,), jnp.float32),
        in_specs=[
            pl.BlockSpec(memory_space=pltpu.SMEM),   # x (2 scalars)
            pl.BlockSpec(memory_space=pltpu.SMEM),   # weights (2 scalars)
        ],
        out_specs=pl.BlockSpec(memory_space=pltpu.SMEM),
    )(x, weights)
    return out[0]


# ----------------------------------------------------------------------------
# 2) Batched variant: B independent gates per pallas_call.
#    Input is presented to the kernel as a single lane-dense slab
#    (2, n_rows, 128): plane 0 = first gate input, plane 1 = second.
# ----------------------------------------------------------------------------
def _or_batched_kernel(w_ref, x_ref, o_ref):
    # Weights are two SMEM scalars broadcast against lane-dense VMEM planes.
    w0 = w_ref[0]
    w1 = w_ref[1]
    ws = x_ref[0] * w0 + x_ref[1] * w1                 # pure VPU, no reduce
    o_ref[...] = jnp.where(ws >= THRESHOLD, jnp.float32(1.0), jnp.float32(0.0))


def mp_neuron_or_batched(x, weights, *, block_rows=1024):
    """x: (B, 2) -> (B,) f32; row b is the OR-gate output for x[b]."""
    B = x.shape[0]
    # Enforce (8,128) tiling on the requested tile.
    block_rows = max(SUBLANES, _round_up(int(block_rows), SUBLANES))

    n_rows = _round_up(pl.cdiv(B, LANES), SUBLANES)

    if n_rows <= _SINGLE_BLOCK_MAX_ROWS:
        # Tiny problem: whole thing in one VMEM block, no grid / pipelining.
        blk = n_rows
        grid_rows = None
    else:
        # Gridded path.  Cap the block at ceil(n_rows/2) so there are always
        # >= 2 grid steps -> the "parallel" axis can shard across both
        # TensorCores on v7x (no effect on single-TC v5e/v6e).
        blk = min(block_rows, _round_up(pl.cdiv(n_rows, 2), SUBLANES))
        n_rows = _round_up(n_rows, blk)
        grid_rows = n_rows // blk

    padded = n_rows * LANES
    xf = x.astype(jnp.float32)
    # Single fused pad + transpose -> one lane-dense (2, n_rows, 128) slab.
    # Padded tail rows are 0 (0*w0 + 0*w1 < 1 -> 0.0) and are sliced off below.
    slab = jnp.pad(xf, ((0, padded - B), (0, 0))).T.reshape(2, n_rows, LANES)
    w = weights.astype(jnp.float32)

    if grid_rows is None:
        out = pl.pallas_call(
            _or_batched_kernel,
            out_shape=jax.ShapeDtypeStruct((n_rows, LANES), jnp.float32),
            in_specs=[
                pl.BlockSpec(memory_space=pltpu.SMEM),   # weights (2 scalars)
                pl.BlockSpec(memory_space=pltpu.VMEM),   # (2, n_rows, 128) slab
            ],
            out_specs=pl.BlockSpec(memory_space=pltpu.VMEM),
        )(w, slab)
    else:
        out = pl.pallas_call(
            _or_batched_kernel,
            out_shape=jax.ShapeDtypeStruct((n_rows, LANES), jnp.float32),
            grid=(grid_rows,),
            in_specs=[
                pl.BlockSpec(memory_space=pltpu.SMEM),                 # weights
                pl.BlockSpec((2, blk, LANES), lambda i: (0, i, 0)),    # slab
            ],
            out_specs=pl.BlockSpec((blk, LANES), lambda i: (i, 0)),
            compiler_params=pltpu.CompilerParams(
                dimension_semantics=("parallel",)),
        )(w, slab)

    return out.reshape(-1)[:B]


if __name__ == "__main__":
    # Deterministic parameter init exactly as in the module's __init__.
    weights = jnp.ones((2,), dtype=jnp.float32)

    # --- single-gate path (exact forward() semantics), one call --------------
    key = jax.random.PRNGKey(0)
    x = jax.random.bernoulli(key, p=0.5, shape=(2,)).astype(jnp.float32)
    out = jax.block_until_ready(mp_neuron_or(x, weights))
    ref = jnp.where(jnp.sum(x * weights) >= THRESHOLD, 1.0, 0.0)
    assert float(out) == float(ref), (float(out), float(ref))

    # --- batched path: full truth table (B = 4, no-grid branch) --------------
    x_tt = jnp.array([[0.0, 0.0], [0.0, 1.0], [1.0, 0.0], [1.0, 1.0]],
                     dtype=jnp.float32)
    got_tt = jax.block_until_ready(mp_neuron_or_batched(x_tt, weights))
    ref_tt = (x_tt @ weights >= THRESHOLD).astype(jnp.float32)
    assert bool(jnp.all(got_tt == ref_tt)), (got_tt, ref_tt)

    # --- batched path: ragged batch (padding path, no-grid branch) -----------
    kb = jax.random.PRNGKey(1)
    xb = jax.random.bernoulli(kb, p=0.5, shape=(300, 2)).astype(jnp.float32)
    got_b = jax.block_until_ready(mp_neuron_or_batched(xb, weights))
    ref_b = (xb @ weights >= THRESHOLD).astype(jnp.float32)
    assert bool(jnp.all(got_b == ref_b))

    # --- batched path: exercise the gridded / "parallel" branch (>=2 steps) --
    kg = jax.random.PRNGKey(2)
    xg = jax.random.bernoulli(kg, p=0.5, shape=(2048, 2)).astype(jnp.float32)
    got_g = jax.block_until_ready(mp_neuron_or_batched(xg, weights))
    ref_g = (xg @ weights >= THRESHOLD).astype(jnp.float32)
    assert bool(jnp.all(got_g == ref_g))

    print("KERNEL_OK")
</pallas_src>

<mosaic_0001>
module attributes {stable_mosaic.version = 11 : i64} {
  func.func @_or_scalar_kernel(%arg0: memref<2xf32, #tpu.memory_space<smem>>, %arg1: memref<2xf32, #tpu.memory_space<smem>>, %arg2: memref<1xf32, #tpu.memory_space<smem>>) attributes {dimension_semantics = [], scalar_prefetch = 0 : i64, scratch_operands = 0 : i64, tpu.core_type = #tpu.core_type<tc>} {
    %c0 = arith.constant 0 : index
    %0 = memref.load %arg0[%c0] : memref<2xf32, #tpu.memory_space<smem>>
    %c0_0 = arith.constant 0 : index
    %1 = memref.load %arg1[%c0_0] : memref<2xf32, #tpu.memory_space<smem>>
    %2 = arith.mulf %0, %1 : f32
    %c1 = arith.constant 1 : index
    %3 = memref.load %arg0[%c1] : memref<2xf32, #tpu.memory_space<smem>>
    %c1_1 = arith.constant 1 : index
    %4 = memref.load %arg1[%c1_1] : memref<2xf32, #tpu.memory_space<smem>>
    %5 = arith.mulf %3, %4 : f32
    %6 = arith.addf %2, %5 : f32
    %cst = arith.constant 1.000000e+00 : f32
    %7 = arith.cmpf oge, %6, %cst : f32
    %cst_2 = arith.constant 1.000000e+00 : f32
    %cst_3 = arith.constant 0.000000e+00 : f32
    %8 = arith.select %7, %cst_2, %cst_3 : f32
    %c0_4 = arith.constant 0 : index
    %9 = memref.load %arg2[%c0_4] : memref<1xf32, #tpu.memory_space<smem>>
    memref.store %8, %arg2[%c0_4] : memref<1xf32, #tpu.memory_space<smem>>
    return
  }
}

</mosaic_0001>

<bundles_post_ra>
// kernel: tpu_custom_call.1
= control target key start
LH: loop header
LB: loop body
LE: loop exit
PB: predicated region body
PF: predicated region fallthrough
CT: control target
= control target key end

     0   :  { %7 = vsyncpa [#allocation3], 0  ;;  %s139_s0 = inlined_call_operand.hbm [shape: f32[2], index: 0, kind: input, shape index: {}]   ;;  %s140_s1 = inlined_call_operand.hbm [shape: f32[2], index: 1, kind: input, shape index: {}]   ;;  %s141_s2 = inlined_call_operand.hbm [shape: f32[1], index: 2, kind: output, shape index: {}]  }
   0x1   :  { %8 = vsyncpa [#allocation6], 0 }
   0x2   :  { %9 = vsyncpa [#allocation4], 0  ;;  %s15_s11 = sshll.u32 %s139_s0, 4  ;;  %s24_s14 = sshll.u32 %s140_s1, 4  ;;  %s16_s11 = int_to_ptr.hbm [resolvable:$true] %s15_s11  ;;  %s25_s14 = int_to_ptr.hbm [resolvable:$true] %s24_s14 }
   0x3   :  { %s112_s15 = smov [#allocation2]   ;;  %s113_s16 = smov [#allocation5]  }
   0x4   :  { %18 = dma.hbm_to_smem %s16_s11, 16, %s112_s15, [#allocation3]  }
   0x5   :  { %27 = dma.hbm_to_smem %s25_s14, 16, %s113_s16, [#allocation6]  }
   0x6   :  { %106 = dma.done.wait [#allocation3], 16  }
   0x7   :  { %107 = vsyncadd [#allocation3], 4294967280 }
   0x8   :  { %108 = dma.done.wait [#allocation6], 16  }
   0x9   :  { %109 = vsyncadd [#allocation6], 4294967280 }
   0xa   :  { %36 = sfence }
   0xb   :  { %s37_s17 = sld [smem:[#allocation2]]  ;;  %s53_s1 = sshll.u32 %s141_s2, 4  ;;  %s54_s1 = int_to_ptr.hbm [resolvable:$true] %s53_s1 }
   0xc   :  { %s38_s18 = sld [smem:[#allocation5]]  ;;  %s114_s26 = smov [#allocation7]  }
   0xd   :  { %s65_s19 = sld [smem:[#allocation2 + $0x1]] }
   0xe   :  { %s66_s20 = sld [smem:[#allocation5 + $0x1]] }
  0x12   :  { %s39_s0 = smul.f32 %s38_s18, %s37_s17 }
  0x14   :  { %s42_s21 = smul.f32 %s66_s20, %s65_s19 }
  0x16   :  { %s43_s22 = sadd.f32 %s42_s21, %s39_s0 }
  0x18   :  { %p44_p0 = scmp.ge.f32.partialorder %s43_s22, 1.0 }
  0x1a   :  { %s45_s25 = scalar_select %p44_p0, 1.0, 0.0 }
  0x1c   :  { %47 = sst [smem:[#allocation7]] %s45_s25 }
  0x1d   :  { %56 = dma.smem_to_hbm %s114_s26, 16, %s54_s1, [#allocation4]  }
  0x1e   :  { %110 = dma.done.wait [#allocation4], 16  }
  0x1f   :  { %111 = vsyncadd [#allocation4], 4294967280 }
  0x20   :  { %61 = sfence }
  0x21   :  { %62 = vsyncpa [#allocation3], 1 }
  0x22   :  { %63 = vsyncpa [#allocation6], 1 }
  0x23   :  { %64 = vsyncpa [#allocation4], 1 }

</bundles_post_ra>
